<compile_context>
chip_gen: v7x
topology: tpu7x:2x2x1
jax: 0.10.0
libtpu: 0.0.40
codegen_flags: <defaults>
</compile_context>

<pallas_src>
import numpy as np
import jax
import jax.numpy as jnp
from jax import lax
from jax.experimental import pallas as pl
from jax.experimental.pallas import tpu as pltpu

K = 5          # depthwise kernel size (nn.Conv2d(..., kernel_size=5))
PAD = K // 2   # 'same' padding
EPS = 1e-6     # LayerNorm2d eps


def convnext_block(x_nchw, params, *, compute_dtype=jnp.bfloat16):
    """ConvNextBlock forward. x_nchw: (N, C, H, W) f32 -> (N, Cout, H, W) f32."""
    N, C, H, W = x_nchw.shape
    C4 = params["w1"].shape[1]          # 4 * C
    Cout = params["w2"].shape[1]
    Q = W * C                           # folded lane width, depthwise / LN stage
    Q4 = W * C4                         # folded lane width, hidden stage
    QO = W * Cout                       # folded lane width, output stage

    # ---- wrapper-side relayout (NCHW module interface) and folding ----
    x_fold = jnp.transpose(x_nchw, (0, 2, 3, 1)).reshape(N, H, Q)

    # Depthwise taps folded over W: one (Q, Q) matrix per H offset i.
    #   dw_fold[i][p, q] = dw[i*K+j, q % C]  where p = q + (j - PAD)*C  and the
    # row is dropped when the source pixel would fall in the W zero-padding.
    qi = np.arange(Q)
    sel = np.zeros((K, Q, Q), np.float32)
    for j in range(K):
        p = qi + (j - PAD) * C
        ok = (p >= 0) & (p < Q)
        sel[j, p[ok], qi[ok]] = 1.0
    dw = params["dw"].astype(jnp.float32)                      # (K*K, C)
    dw_fold = jnp.stack([
        sum(jnp.asarray(sel[j]) * jnp.tile(dw[i * K + j], W)[None, :]
            for j in range(K))
        for i in range(K)
    ])                                                         # (K, Q, Q) f32

    dwb_fold = jnp.tile(params["dwb"], (1, W)).astype(jnp.float32)   # (1, Q)
    lnw_fold = jnp.tile(params["lnw"], (1, W)).astype(jnp.float32)   # (1, Q)
    lnb_fold = jnp.tile(params["lnb"], (1, W)).astype(jnp.float32)   # (1, Q)

    # Per-pixel channel average as a block-diagonal matmul (runs on the MXU).
    aavg = jnp.asarray(np.kron(np.eye(W, dtype=np.float32),
                               np.ones((C, C), np.float32) / C))     # (Q, Q)

    # 1x1 convs as block-diagonal folded weights (MXU operands in compute_dtype,
    # accumulation always f32, biases added in f32).
    w1_fold = jnp.kron(jnp.eye(W, dtype=jnp.float32),
                       params["w1"].astype(jnp.float32)).astype(compute_dtype)  # (Q, Q4)
    w2_fold = jnp.kron(jnp.eye(W, dtype=jnp.float32),
                       params["w2"].astype(jnp.float32)).astype(compute_dtype)  # (Q4, QO)
    b1_fold = jnp.tile(params["b1"], (1, W)).astype(jnp.float32)      # (1, Q4)
    b2_fold = jnp.tile(params["b2"], (1, W)).astype(jnp.float32)      # (1, QO)

    def kernel(x_ref, dw_ref, dwb_ref, lnw_ref, lnb_ref, aavg_ref,
               w1_ref, b1_ref, w2_ref, b2_ref, out_ref, xpad_ref):
        # ---- H-halo'd folded input in VMEM: zero ONLY the halo strips ----
        zrow = jnp.zeros((PAD, Q), jnp.float32)
        xpad_ref[0:PAD, :] = zrow
        xpad_ref[PAD + H:PAD + H + PAD, :] = zrow
        xpad_ref[PAD:PAD + H, :] = x_ref[0].astype(jnp.float32)   # interior once

        # ---- depthwise 5x5, 'same', groups=C: 5 H-shifted planes, W taps on MXU
        acc = jnp.zeros((H, Q), jnp.float32)
        for i in range(K):                                         # 5 sublane slices
            acc = acc + jnp.dot(xpad_ref[i:i + H, :], dw_ref[i],
                                preferred_element_type=jnp.float32)
        acc = acc + dwb_ref[...]

        # ---- LayerNorm over channels (per pixel), fully in folded layout ----
        mean_b = jnp.dot(acc, aavg_ref[...], preferred_element_type=jnp.float32)
        d = acc - mean_b
        var_b = jnp.dot(d * d, aavg_ref[...], preferred_element_type=jnp.float32)
        xn = d * lax.rsqrt(var_b + EPS)
        xn = xn * lnw_ref[...] + lnb_ref[...]

        # ---- 1x1 convs (block-diagonal folded weights) + exact (erf) GELU ----
        cd = w1_ref.dtype
        h = jnp.dot(xn.astype(cd), w1_ref[...],
                    preferred_element_type=jnp.float32) + b1_ref[...]
        h = 0.5 * h * (1.0 + lax.erf(h * 0.7071067811865476))
        y = jnp.dot(h.astype(cd), w2_ref[...],
                    preferred_element_type=jnp.float32) + b2_ref[...]

        # TODO(synk): Dropout2d(p=0.2) is identity here (eval mode).
        out_ref[...] = y.astype(out_ref.dtype)                    # (H, QO) lane-dense

    w2d = lambda n: (0, 0)      # constant index maps -> weights stay VMEM-resident
    w3d = lambda n: (0, 0, 0)

    out = pl.pallas_call(
        kernel,
        out_shape=jax.ShapeDtypeStruct((N * H, QO), jnp.float32),
        grid=(N,),                                     # one batch per step (megacore)
        in_specs=[
            pl.BlockSpec((1, H, Q), lambda n: (n, 0, 0)),   # folded input, per batch
            pl.BlockSpec((K, Q, Q), w3d),                   # folded depthwise taps
            pl.BlockSpec((1, Q), w2d),                      # depthwise bias
            pl.BlockSpec((1, Q), w2d),                      # LN weight
            pl.BlockSpec((1, Q), w2d),                      # LN bias
            pl.BlockSpec((Q, Q), w2d),                      # group-average matrix
            pl.BlockSpec((Q, Q4), w2d),                     # conv1 weight (block-diag)
            pl.BlockSpec((1, Q4), w2d),                     # conv1 bias
            pl.BlockSpec((Q4, QO), w2d),                    # conv2 weight (block-diag)
            pl.BlockSpec((1, QO), w2d),                     # conv2 bias
        ],
        out_specs=pl.BlockSpec((H, QO), lambda n: (n, 0)),
        scratch_shapes=[pltpu.VMEM((H + 2 * PAD, Q), jnp.float32)],  # H-halo only
        compiler_params=pltpu.CompilerParams(
            dimension_semantics=("parallel",),          # batch steps -> v7x 2 TCs
            vmem_limit_bytes=16 * 1024 * 1024,          # actual usage << 1 MiB
        ),
    )(x_fold, dw_fold, dwb_fold, lnw_fold, lnb_fold, aavg,
      w1_fold, b1_fold, w2_fold, b2_fold)

    # Unfold back to the module's NCHW interface (wrapper / XLA side).
    y = out.reshape(N, H, W, Cout)
    return jnp.transpose(y, (0, 3, 1, 2))


def init_params(key, input_dim, output_dim):
    """Deterministic synthetic parameters matching the nn.Module shapes."""
    C = input_dim
    ks = jax.random.split(key, 8)
    s = 0.1
    return dict(
        dw=jax.random.normal(ks[0], (K * K, C), jnp.float32) * s,          # (C,1,5,5) -> (25,C)
        dwb=jax.random.normal(ks[1], (1, C), jnp.float32) * s,
        lnw=1.0 + jax.random.normal(ks[2], (1, C), jnp.float32) * s,
        lnb=jax.random.normal(ks[3], (1, C), jnp.float32) * s,
        w1=jax.random.normal(ks[4], (C, 4 * C), jnp.float32) * s,          # (4C,C,1,1) -> (C,4C)
        b1=jax.random.normal(ks[5], (1, 4 * C), jnp.float32) * s,
        w2=jax.random.normal(ks[6], (4 * C, output_dim), jnp.float32) * s, # (Cout,4C,1,1) -> (4C,Cout)
        b2=jax.random.normal(ks[7], (1, output_dim), jnp.float32) * s,
    )


def reference(x_nchw, p):
    """Pure-JAX reference of ConvNextBlock.forward (dropout in eval mode)."""
    N, C, H, W = x_nchw.shape
    x = jnp.transpose(x_nchw, (0, 2, 3, 1))
    rhs = p["dw"].reshape(K, K, 1, C)                                      # HWIO, groups=C
    y = lax.conv_general_dilated(
        x, rhs, (1, 1), "SAME",
        dimension_numbers=("NHWC", "HWIO", "NHWC"),
        feature_group_count=C) + p["dwb"][0]
    mean = jnp.mean(y, -1, keepdims=True)
    var = jnp.mean((y - mean) ** 2, -1, keepdims=True)
    y = (y - mean) * lax.rsqrt(var + EPS)
    y = y * p["lnw"][0] + p["lnb"][0]
    h = y @ p["w1"] + p["b1"][0]
    h = 0.5 * h * (1.0 + lax.erf(h / jnp.sqrt(2.0)))
    out = h @ p["w2"] + p["b2"][0]
    return jnp.transpose(out, (0, 3, 1, 2))


if __name__ == "__main__":
    N, C, H, W = 2, 4, 16, 16      # input_dim = 4
    Cout = 8                       # output_dim = 8

    key = jax.random.PRNGKey(0)
    kx, kp = jax.random.split(key)
    x = jax.random.normal(kx, (N, C, H, W), jnp.float32)
    params = init_params(kp, C, Cout)

    ref = jax.block_until_ready(reference(x, params))

    # f32 MXU-operand path: tight parity gate against the module semantics.
    out_f32 = jax.block_until_ready(
        convnext_block(x, params, compute_dtype=jnp.float32))
    assert out_f32.shape == (N, Cout, H, W), out_f32.shape
    if not np.allclose(np.asarray(out_f32), np.asarray(ref), rtol=1e-3, atol=1e-3):
        raise AssertionError("f32 Pallas kernel does not match JAX reference")

    # bf16 MXU-operand path (v6e/v7x fast path), f32 accumulation.
    out_bf16 = jax.block_until_ready(
        convnext_block(x, params, compute_dtype=jnp.bfloat16))
    assert out_bf16.shape == (N, Cout, H, W), out_bf16.shape
    if not np.allclose(np.asarray(out_bf16), np.asarray(ref), rtol=1e-2, atol=1e-2):
        raise AssertionError("bf16 Pallas kernel does not match JAX reference")

    print("KERNEL_OK")
</pallas_src>

<mosaic_0001>
module attributes {stable_mosaic.version = 11 : i64} {
  func.func @kernel(%arg0: i32, %arg1: memref<1x16x64xf32, #tpu.memory_space<vmem>>, %arg2: memref<5x64x64xf32, #tpu.memory_space<vmem>>, %arg3: memref<1x64xf32, #tpu.memory_space<vmem>>, %arg4: memref<1x64xf32, #tpu.memory_space<vmem>>, %arg5: memref<1x64xf32, #tpu.memory_space<vmem>>, %arg6: memref<64x64xf32, #tpu.memory_space<vmem>>, %arg7: memref<64x256xf32, #tpu.memory_space<vmem>>, %arg8: memref<1x256xf32, #tpu.memory_space<vmem>>, %arg9: memref<256x128xf32, #tpu.memory_space<vmem>>, %arg10: memref<1x128xf32, #tpu.memory_space<vmem>>, %arg11: memref<16x128xf32, #tpu.memory_space<vmem>>, %arg12: memref<20x64xf32, #tpu.memory_space<vmem>>) attributes {dimension_semantics = [#tpu.dimension_semantics<parallel>], iteration_bounds = array<i64: 2>, scalar_prefetch = 0 : i64, scratch_operands = 1 : i64, tpu.core_type = #tpu.core_type<tc>, window_params = [{transform_indices = @transform_0, window_bounds = array<i64: 1, 16, 64>}, {pipeline_mode = #tpu.pipeline_mode<synchronous>, transform_indices = @transform_1, window_bounds = array<i64: 5, 64, 64>}, {pipeline_mode = #tpu.pipeline_mode<synchronous>, transform_indices = @transform_2, window_bounds = array<i64: 1, 64>}, {pipeline_mode = #tpu.pipeline_mode<synchronous>, transform_indices = @transform_3, window_bounds = array<i64: 1, 64>}, {pipeline_mode = #tpu.pipeline_mode<synchronous>, transform_indices = @transform_4, window_bounds = array<i64: 1, 64>}, {pipeline_mode = #tpu.pipeline_mode<synchronous>, transform_indices = @transform_5, window_bounds = array<i64: 64, 64>}, {pipeline_mode = #tpu.pipeline_mode<synchronous>, transform_indices = @transform_6, window_bounds = array<i64: 64, 256>}, {pipeline_mode = #tpu.pipeline_mode<synchronous>, transform_indices = @transform_7, window_bounds = array<i64: 1, 256>}, {pipeline_mode = #tpu.pipeline_mode<synchronous>, transform_indices = @transform_8, window_bounds = array<i64: 256, 128>}, {pipeline_mode = #tpu.pipeline_mode<synchronous>, transform_indices = @transform_9, window_bounds = array<i64: 1, 128>}, {transform_indices = @transform_10, window_bounds = array<i64: 16, 128>}]} {
    %cst = arith.constant 0.000000e+00 : f32
    %0 = vector.broadcast %cst : f32 to vector<2x64xf32>
    %c0 = arith.constant 0 : index
    %c0_0 = arith.constant 0 : index
    %1 = vector.load %arg12[%c0, %c0_0] : memref<20x64xf32, #tpu.memory_space<vmem>>, vector<2x64xf32>
    tpu.vector_store %arg12[%c0, %c0_0], %0 {strides = array<i32>} : memref<20x64xf32, #tpu.memory_space<vmem>>, vector<2x64xf32>,
    %c18 = arith.constant 18 : index
    %c0_1 = arith.constant 0 : index
    %2 = vector.load %arg12[%c18, %c0_1] : memref<20x64xf32, #tpu.memory_space<vmem>>, vector<2x64xf32>
    tpu.vector_store %arg12[%c18, %c0_1], %0 {strides = array<i32>} : memref<20x64xf32, #tpu.memory_space<vmem>>, vector<2x64xf32>,
    %c0_2 = arith.constant 0 : index
    %c0_3 = arith.constant 0 : index
    %c0_4 = arith.constant 0 : index
    %3 = vector.load %arg1[%c0_2, %c0_3, %c0_4] : memref<1x16x64xf32, #tpu.memory_space<vmem>>, vector<1x16x64xf32>
    %4 = vector.shape_cast %3 : vector<1x16x64xf32> to vector<16x64xf32>
    %c2 = arith.constant 2 : index
    %c0_5 = arith.constant 0 : index
    %5 = vector.load %arg12[%c2, %c0_5] : memref<20x64xf32, #tpu.memory_space<vmem>>, vector<16x64xf32>
    tpu.vector_store %arg12[%c2, %c0_5], %4 {strides = array<i32>} : memref<20x64xf32, #tpu.memory_space<vmem>>, vector<16x64xf32>,
    %cst_6 = arith.constant 0.000000e+00 : f32
    %6 = vector.broadcast %cst_6 : f32 to vector<16x64xf32>
    %c0_7 = arith.constant 0 : index
    %c0_8 = arith.constant 0 : index
    %7 = vector.load %arg12[%c0_7, %c0_8] : memref<20x64xf32, #tpu.memory_space<vmem>>, vector<16x64xf32>
    %c0_9 = arith.constant 0 : index
    %c0_10 = arith.constant 0 : index
    %c0_11 = arith.constant 0 : index
    %8 = vector.load %arg2[%c0_9, %c0_10, %c0_11] : memref<5x64x64xf32, #tpu.memory_space<vmem>>, vector<1x64x64xf32>
    %9 = vector.shape_cast %8 : vector<1x64x64xf32> to vector<64x64xf32>
    %cst_12 = arith.constant dense<0.000000e+00> : vector<16x64xf32>
    %10 = tpu.matmul %7, %9, %cst_12 {dimension_numbers = #tpu.dot_dimension_numbers<[1], [0], [0], [1], [0, 0, 1, 1], [], []>} : vector<16x64xf32>, vector<64x64xf32>, vector<16x64xf32> -> vector<16x64xf32>
    %11 = arith.addf %6, %10 : vector<16x64xf32>
    %c1 = arith.constant 1 : index
    %c0_13 = arith.constant 0 : index
    %12 = vector.load %arg12[%c1, %c0_13] : memref<20x64xf32, #tpu.memory_space<vmem>>, vector<16x64xf32>
    %c1_14 = arith.constant 1 : index
    %c0_15 = arith.constant 0 : index
    %c0_16 = arith.constant 0 : index
    %13 = vector.load %arg2[%c1_14, %c0_15, %c0_16] : memref<5x64x64xf32, #tpu.memory_space<vmem>>, vector<1x64x64xf32>
    %14 = vector.shape_cast %13 : vector<1x64x64xf32> to vector<64x64xf32>
    %cst_17 = arith.constant dense<0.000000e+00> : vector<16x64xf32>
    %15 = tpu.matmul %12, %14, %cst_17 {dimension_numbers = #tpu.dot_dimension_numbers<[1], [0], [0], [1], [0, 0, 1, 1], [], []>} : vector<16x64xf32>, vector<64x64xf32>, vector<16x64xf32> -> vector<16x64xf32>
    %16 = arith.addf %11, %15 : vector<16x64xf32>
    %c2_18 = arith.constant 2 : index
    %c0_19 = arith.constant 0 : index
    %17 = vector.load %arg12[%c2_18, %c0_19] : memref<20x64xf32, #tpu.memory_space<vmem>>, vector<16x64xf32>
    %c2_20 = arith.constant 2 : index
    %c0_21 = arith.constant 0 : index
    %c0_22 = arith.constant 0 : index
    %18 = vector.load %arg2[%c2_20, %c0_21, %c0_22] : memref<5x64x64xf32, #tpu.memory_space<vmem>>, vector<1x64x64xf32>
    %19 = vector.shape_cast %18 : vector<1x64x64xf32> to vector<64x64xf32>
    %cst_23 = arith.constant dense<0.000000e+00> : vector<16x64xf32>
    %20 = tpu.matmul %17, %19, %cst_23 {dimension_numbers = #tpu.dot_dimension_numbers<[1], [0], [0], [1], [0, 0, 1, 1], [], []>} : vector<16x64xf32>, vector<64x64xf32>, vector<16x64xf32> -> vector<16x64xf32>
    %21 = arith.addf %16, %20 : vector<16x64xf32>
    %c3 = arith.constant 3 : index
    %c0_24 = arith.constant 0 : index
    %22 = vector.load %arg12[%c3, %c0_24] : memref<20x64xf32, #tpu.memory_space<vmem>>, vector<16x64xf32>
    %c3_25 = arith.constant 3 : index
    %c0_26 = arith.constant 0 : index
    %c0_27 = arith.constant 0 : index
    %23 = vector.load %arg2[%c3_25, %c0_26, %c0_27] : memref<5x64x64xf32, #tpu.memory_space<vmem>>, vector<1x64x64xf32>
    %24 = vector.shape_cast %23 : vector<1x64x64xf32> to vector<64x64xf32>
    %cst_28 = arith.constant dense<0.000000e+00> : vector<16x64xf32>
    %25 = tpu.matmul %22, %24, %cst_28 {dimension_numbers = #tpu.dot_dimension_numbers<[1], [0], [0], [1], [0, 0, 1, 1], [], []>} : vector<16x64xf32>, vector<64x64xf32>, vector<16x64xf32> -> vector<16x64xf32>
    %26 = arith.addf %21, %25 : vector<16x64xf32>
    %c4 = arith.constant 4 : index
    %c0_29 = arith.constant 0 : index
    %27 = vector.load %arg12[%c4, %c0_29] : memref<20x64xf32, #tpu.memory_space<vmem>>, vector<16x64xf32>
    %c4_30 = arith.constant 4 : index
    %c0_31 = arith.constant 0 : index
    %c0_32 = arith.constant 0 : index
    %28 = vector.load %arg2[%c4_30, %c0_31, %c0_32] : memref<5x64x64xf32, #tpu.memory_space<vmem>>, vector<1x64x64xf32>
    %29 = vector.shape_cast %28 : vector<1x64x64xf32> to vector<64x64xf32>
    %cst_33 = arith.constant dense<0.000000e+00> : vector<16x64xf32>
    %30 = tpu.matmul %27, %29, %cst_33 {dimension_numbers = #tpu.dot_dimension_numbers<[1], [0], [0], [1], [0, 0, 1, 1], [], []>} : vector<16x64xf32>, vector<64x64xf32>, vector<16x64xf32> -> vector<16x64xf32>
    %31 = arith.addf %26, %30 : vector<16x64xf32>
    %c0_34 = arith.constant 0 : index
    %c0_35 = arith.constant 0 : index
    %32 = vector.load %arg3[%c0_34, %c0_35] : memref<1x64xf32, #tpu.memory_space<vmem>>, vector<1x64xf32>
    %33 = vector.broadcast %32 : vector<1x64xf32> to vector<16x64xf32>
    %34 = arith.addf %31, %33 : vector<16x64xf32>
    %c0_36 = arith.constant 0 : index
    %c0_37 = arith.constant 0 : index
    %35 = vector.load %arg6[%c0_36, %c0_37] : memref<64x64xf32, #tpu.memory_space<vmem>>, vector<64x64xf32>
    %cst_38 = arith.constant dense<0.000000e+00> : vector<16x64xf32>
    %36 = tpu.matmul %34, %35, %cst_38 {dimension_numbers = #tpu.dot_dimension_numbers<[1], [0], [0], [1], [0, 0, 1, 1], [], []>} : vector<16x64xf32>, vector<64x64xf32>, vector<16x64xf32> -> vector<16x64xf32>
    %37 = arith.subf %34, %36 : vector<16x64xf32>
    %38 = arith.mulf %37, %37 : vector<16x64xf32>
    %c0_39 = arith.constant 0 : index
    %c0_40 = arith.constant 0 : index
    %39 = vector.load %arg6[%c0_39, %c0_40] : memref<64x64xf32, #tpu.memory_space<vmem>>, vector<64x64xf32>
    %cst_41 = arith.constant dense<0.000000e+00> : vector<16x64xf32>
    %40 = tpu.matmul %38, %39, %cst_41 {dimension_numbers = #tpu.dot_dimension_numbers<[1], [0], [0], [1], [0, 0, 1, 1], [], []>} : vector<16x64xf32>, vector<64x64xf32>, vector<16x64xf32> -> vector<16x64xf32>
    %cst_42 = arith.constant 9.99999997E-7 : f32
    %41 = vector.broadcast %cst_42 : f32 to vector<16x64xf32>
    %42 = arith.addf %40, %41 : vector<16x64xf32>
    %43 = math.rsqrt %42 : vector<16x64xf32>
    %44 = arith.mulf %37, %43 : vector<16x64xf32>
    %c0_43 = arith.constant 0 : index
    %c0_44 = arith.constant 0 : index
    %45 = vector.load %arg4[%c0_43, %c0_44] : memref<1x64xf32, #tpu.memory_space<vmem>>, vector<1x64xf32>
    %46 = vector.broadcast %45 : vector<1x64xf32> to vector<16x64xf32>
    %47 = arith.mulf %44, %46 : vector<16x64xf32>
    %c0_45 = arith.constant 0 : index
    %c0_46 = arith.constant 0 : index
    %48 = vector.load %arg5[%c0_45, %c0_46] : memref<1x64xf32, #tpu.memory_space<vmem>>, vector<1x64xf32>
    %49 = vector.broadcast %48 : vector<1x64xf32> to vector<16x64xf32>
    %50 = arith.addf %47, %49 : vector<16x64xf32>
    %c0_47 = arith.constant 0 : index
    %c0_48 = arith.constant 0 : index
    %51 = vector.load %arg7[%c0_47, %c0_48] : memref<64x256xf32, #tpu.memory_space<vmem>>, vector<64x256xf32>
    %cst_49 = arith.constant dense<0.000000e+00> : vector<16x256xf32>
    %52 = tpu.matmul %50, %51, %cst_49 {dimension_numbers = #tpu.dot_dimension_numbers<[1], [0], [0], [1], [0, 0, 1, 1], [], []>} : vector<16x64xf32>, vector<64x256xf32>, vector<16x256xf32> -> vector<16x256xf32>
    %c0_50 = arith.constant 0 : index
    %c0_51 = arith.constant 0 : index
    %53 = vector.load %arg8[%c0_50, %c0_51] : memref<1x256xf32, #tpu.memory_space<vmem>>, vector<1x256xf32>
    %54 = vector.broadcast %53 : vector<1x256xf32> to vector<16x256xf32>
    %55 = arith.addf %52, %54 : vector<16x256xf32>
    %cst_52 = arith.constant 5.000000e-01 : f32
    %56 = vector.broadcast %cst_52 : f32 to vector<16x256xf32>
    %57 = arith.mulf %56, %55 : vector<16x256xf32>
    %cst_53 = arith.constant 0.707106769 : f32
    %58 = vector.broadcast %cst_53 : f32 to vector<16x256xf32>
    %59 = arith.mulf %55, %58 : vector<16x256xf32>
    %60 = math.erf %59 : vector<16x256xf32>
    %cst_54 = arith.constant 1.000000e+00 : f32
    %61 = vector.broadcast %cst_54 : f32 to vector<16x256xf32>
    %62 = arith.addf %61, %60 : vector<16x256xf32>
    %63 = arith.mulf %57, %62 : vector<16x256xf32>
    %c0_55 = arith.constant 0 : index
    %c0_56 = arith.constant 0 : index
    %64 = vector.load %arg9[%c0_55, %c0_56] : memref<256x128xf32, #tpu.memory_space<vmem>>, vector<256x128xf32>
    %cst_57 = arith.constant dense<0.000000e+00> : vector<16x128xf32>
    %65 = tpu.matmul %63, %64, %cst_57 {dimension_numbers = #tpu.dot_dimension_numbers<[1], [0], [0], [1], [0, 0, 1, 1], [], []>} : vector<16x256xf32>, vector<256x128xf32>, vector<16x128xf32> -> vector<16x128xf32>
    %c0_58 = arith.constant 0 : index
    %c0_59 = arith.constant 0 : index
    %66 = vector.load %arg10[%c0_58, %c0_59] : memref<1x128xf32, #tpu.memory_space<vmem>>, vector<1x128xf32>
    %67 = vector.broadcast %66 : vector<1x128xf32> to vector<16x128xf32>
    %68 = arith.addf %65, %67 : vector<16x128xf32>
    %c0_60 = arith.constant 0 : index
    %c0_61 = arith.constant 0 : index
    %69 = vector.load %arg11[%c0_60, %c0_61] : memref<16x128xf32, #tpu.memory_space<vmem>>, vector<16x128xf32>
    tpu.vector_store %arg11[%c0_60, %c0_61], %68 {strides = array<i32>} : memref<16x128xf32, #tpu.memory_space<vmem>>, vector<16x128xf32>,
    return
  }
  func.func @transform_0(%arg0: i32) -> (i32, i32, i32) {
    %c0_i32 = arith.constant 0 : i32
    %c0_i32_0 = arith.constant 0 : i32
    %c0_i32_1 = arith.constant 0 : i32
    return %arg0, %c0_i32, %c0_i32_0 : i32, i32, i32
  }
  func.func @transform_1(%arg0: i32) -> (i32, i32, i32) {
    %c0_i32 = arith.constant 0 : i32
    %c0_i32_0 = arith.constant 0 : i32
    %c0_i32_1 = arith.constant 0 : i32
    %c0_i32_2 = arith.constant 0 : i32
    return %c0_i32, %c0_i32_0, %c0_i32_1 : i32, i32, i32
  }
  func.func @transform_2(%arg0: i32) -> (i32, i32) {
    %c0_i32 = arith.constant 0 : i32
    %c0_i32_0 = arith.constant 0 : i32
    %c0_i32_1 = arith.constant 0 : i32
    return %c0_i32, %c0_i32_0 : i32, i32
  }
  func.func @transform_3(%arg0: i32) -> (i32, i32) {
    %c0_i32 = arith.constant 0 : i32
    %c0_i32_0 = arith.constant 0 : i32
    %c0_i32_1 = arith.constant 0 : i32
    return %c0_i32, %c0_i32_0 : i32, i32
  }
  func.func @transform_4(%arg0: i32) -> (i32, i32) {
    %c0_i32 = arith.constant 0 : i32
    %c0_i32_0 = arith.constant 0 : i32
    %c0_i32_1 = arith.constant 0 : i32
    return %c0_i32, %c0_i32_0 : i32, i32
  }
  func.func @transform_5(%arg0: i32) -> (i32, i32) {
    %c0_i32 = arith.constant 0 : i32
    %c0_i32_0 = arith.constant 0 : i32
    %c0_i32_1 = arith.constant 0 : i32
    return %c0_i32, %c0_i32_0 : i32, i32
  }
  func.func @transform_6(%arg0: i32) -> (i32, i32) {
    %c0_i32 = arith.constant 0 : i32
    %c0_i32_0 = arith.constant 0 : i32
    %c0_i32_1 = arith.constant 0 : i32
    return %c0_i32, %c0_i32_0 : i32, i32
  }
  func.func @transform_7(%arg0: i32) -> (i32, i32) {
    %c0_i32 = arith.constant 0 : i32
    %c0_i32_0 = arith.constant 0 : i32
    %c0_i32_1 = arith.constant 0 : i32
    return %c0_i32, %c0_i32_0 : i32, i32
  }
  func.func @transform_8(%arg0: i32) -> (i32, i32) {
    %c0_i32 = arith.constant 0 : i32
    %c0_i32_0 = arith.constant 0 : i32
    %c0_i32_1 = arith.constant 0 : i32
    return %c0_i32, %c0_i32_0 : i32, i32
  }
  func.func @transform_9(%arg0: i32) -> (i32, i32) {
    %c0_i32 = arith.constant 0 : i32
    %c0_i32_0 = arith.constant 0 : i32
    %c0_i32_1 = arith.constant 0 : i32
    return %c0_i32, %c0_i32_0 : i32, i32
  }
  func.func @transform_10(%arg0: i32) -> (i32, i32) {
    %c0_i32 = arith.constant 0 : i32
    %c0_i32_0 = arith.constant 0 : i32
    return %arg0, %c0_i32 : i32, i32
  }
}

</mosaic_0001>

<bundles_post_ra>
// kernel: tpu_custom_call.1
= control target key start
LH: loop header
LB: loop body
LE: loop exit
PB: predicated region body
PF: predicated region fallthrough
CT: control target
= control target key end

     0   :  { %s2684_s0 = inlined_call_operand.hbm [shape: f32[2,16,64], index: 0, kind: input, shape index: {}]   ;;  %s2685_s1 = inlined_call_operand.hbm [shape: f32[5,64,64], index: 1, kind: input, shape index: {}]   ;;  %s2686_s2 = inlined_call_operand.vmem [shape: f32[1,64], index: 2, kind: input, shape index: {}]   ;;  %s2687_s3 = inlined_call_operand.vmem [shape: f32[1,64], index: 3, kind: input, shape index: {}]   ;;  %s2688_s4 = inlined_call_operand.vmem [shape: f32[1,64], index: 4, kind: input, shape index: {}]   ;;  %s2689_s5 = inlined_call_operand.hbm [shape: f32[64,64], index: 5, kind: input, shape index: {}]   ;;  %s2690_s6 = inlined_call_operand.hbm [shape: f32[64,256], index: 6, kind: input, shape index: {}]   ;;  %s2691_s7 = inlined_call_operand.vmem [shape: f32[1,256], index: 7, kind: input, shape index: {}]   ;;  %s2692_s8 = inlined_call_operand.hbm [shape: f32[256,128], index: 8, kind: input, shape index: {}]   ;;  %s2693_s9 = inlined_call_operand.vmem [shape: f32[1,128], index: 9, kind: input, shape index: {}]   ;;  %s2694_s10 = inlined_call_operand.hbm [shape: f32[32,128], index: 10, kind: output, shape index: {}]  }
   0x1   :  { %2705 = sst [smem:[#allocation19_spill]] %s2685_s1 }
   0x2   :  { %2706 = sst [smem:[#allocation20_spill]] %s2694_s10 }
   0x3   :  { %15 = vsyncpa [#allocation4], 0 }
   0x4   :  { %17 = vsyncpa [#allocation4 + $0x1], 0 }
   0x5   :  { %18 = vsyncpa [#allocation7], 0 }
   0x6   :  { %19 = vsyncpa [#allocation10], 0 }
   0x7   :  { %20 = vsyncpa [#allocation5], 0 }
   0x8   :  { %22 = vsyncpa [#allocation5 + $0x1], 0  ;;  %s2332_s13 = smov 0   ;;  %s2334_s14 = smov 0  }
   0x9   :  { %s2336_s15 = smov 0   ;;  %s2338_s16 = smov 0  }
   0xa LB: > { %2707 = sst [smem:[#allocation17_spill]] %s2250_s13  ;;  %s2353_s17 = sadd.s32 4294967295, %s2262_s16   ;;  %s2262_s16 = sphi %s2338_s16, %s2734_s16   ;;  %s2258_s15 = sphi %s2336_s15, %s2733_s15   ;;  %s2254_s14 = sphi %s2334_s14, %s2732_s14   ;;  %s2250_s13 = sphi %s2332_s13, %s2731_s13  }
   0xb   : > { %s1487_s18 = sadd.s32 4294967294, %s2262_s16   ;;  %p48_p0 = scmp.ne.s32.totalorder %s2254_s14, %s2250_s13 }
   0xc   : > { %p2695_p1 = scmp.eq.s32.totalorder %s2353_s17, 0  ;;  %p267_p3 = scmp.eq.s32.totalorder %s1487_s18, 1 }
   0xd   : > { %p1488_p5 = scmp.ge.s32.totalorder %s2262_s16, 1  ;;  %p274_p7 = scmp.lt.s32.totalorder %s2262_s16, 3 }
   0xe   : > { %p2362_p4 = por %p2695_p1, %p48_p0  ;;  %p2367_p6 = por %p267_p3, %p48_p0 }
   0xf   : > { %p2372_p8 = pnand %p1488_p5, %p274_p7  ;;  %s2264_s22 = smov [#allocation6]  }
  0x10   : > { %s2708_s19 = scalar_select %p2362_p4, 1, 0 }
  0x11   : > { %s2709_s20 = scalar_select %p2367_p6, 1, 0 }
  0x12   : > { %s2711_s21 = scalar_select %p2372_p8, 1, 0 }
  0x13   : > { %2710 = sst [smem:[#allocation18_spill]] %s2709_s20  ;;  %s286_s23 = sshll.u32 %s2264_s22, 4  ;;  %s2376_s23 = int_to_ptr.vmem [resolvable:$true] %s286_s23 }
  0x14   : > { %p1960_p9 = pneg %p2372_p8  ;;  %s2265_s25 = smov [#allocation9]  }
  0x15   : > { %s321_s26 = sshll.u32 %s2265_s25, 4  ;;  %s2713_s1 = sld [smem:[#allocation19_spill]]  ;;  %s2387_s26 = int_to_ptr.vmem [resolvable:$true] %s321_s26 }
  0x16   : > { %p2383_p11 = pnand %p1960_p9, %p2695_p1 }
  0x18   : > { %p2397_p13 = pneg %p2383_p11 }
  0x1b   : > { %s2046_s29 = scalar_lea.hbm %s2713_s1, 5120 }
  0x1c   : > { %p2047_p12 = scmp.ne.s32.totalorder %s2713_s1, %s2046_s29  ;;  %p2053_p5 = scmp.lt.u32.totalorder %s2046_s29, %s2713_s1 }
  0x1e   : > { %p2049_p0 = pnand %p2397_p13, %p2047_p12 }
  0x20   : > { %p2050_p3 = pneg %p2049_p0 }
  0x22   : > { %p2055_p7 = pnand %p2053_p5, %p2050_p3 }
  0x24   : > { %2058 = shalt.err (!%p2055_p7)
}
  0x25   : > { %s2059_s25 = scalar_lea.vmem %s2376_s23, 5120  ;;  %p2067_p2 = scmp.lt.s32.totalorder %s2376_s23, %s2376_s23 }
  0x26   : > { %p2060_p9 = scmp.ne.s32.totalorder %s2376_s23, %s2059_s25  ;;  %p2068_p6 = scmp.lt.s32.totalorder %s2059_s25, %s2059_s25 }
  0x28   : > { %p2062_p10 = pnand %p2060_p9, %p2397_p13  ;;  %p2069_p12 = por %p2068_p6, %p2067_p2 }
  0x2a   : > { %p2063_p1 = pneg %p2062_p10 }
  0x2c   : > { %p2070_p0 = pnand %p2069_p12, %p2063_p1 }
  0x2e   : > { %2073 = shalt.err (!%p2070_p0)
}
  0x2f   : > { %s2699_s27 = smov 128   ;;  %s2701_s28 = smov 8  }
  0x30   : > { %1963 = dma.hbm_to_vmem [thread:$0]  (!%p2383_p11), %s2713_s1, 5120, %s2376_s23, [#allocation7], %s2699_s27, %s2699_s27, %s2701_s28  }
  0x31   : > { %s2074_s22 = scalar_lea.hbm %s2690_s6, 2048 }
  0x32   : > { %p2075_p1 = scmp.ne.s32.totalorder %s2690_s6, %s2074_s22  ;;  %p2081_p10 = scmp.lt.u32.totalorder %s2074_s22, %s2690_s6 }
  0x34   : > { %p2077_p2 = pnand %p2075_p1, %p2397_p13 }
  0x36   : > { %p2078_p6 = pneg %p2077_p2 }
  0x38   : > { %p2083_p3 = pnand %p2081_p10, %p2078_p6 }
  0x3a   : > { %2086 = shalt.err (!%p2083_p3)
}
  0x3b   : > { %s2087_s23 = scalar_lea.vmem %s2387_s26, 2048  ;;  %p2095_p12 = scmp.lt.s32.totalorder %s2387_s26, %s2387_s26 }
  0x3c   : > { %p2088_p5 = scmp.ne.s32.totalorder %s2387_s26, %s2087_s23  ;;  %p2096_p0 = scmp.lt.s32.totalorder %s2087_s23, %s2087_s23 }
  0x3e   : > { %p2090_p7 = pnand %p2088_p5, %p2397_p13  ;;  %p2097_p1 = por %p2096_p0, %p2095_p12 }
  0x40   : > { %p2091_p9 = pneg %p2090_p7 }
  0x42   : > { %p2098_p2 = pnand %p2097_p1, %p2091_p9 }
  0x44   : > { %2101 = shalt.err (!%p2098_p2)
}
  0x45   : > { %s2268_s20 = smov 256   ;;  %s2269_s10 = smov 16  }
  0x46   : > { %1969 = dma.hbm_to_vmem [thread:$0]  (!%p2383_p11), %s2690_s6, 2048, %s2387_s26, [#allocation10], %s2268_s20, %s2268_s20, %s2269_s10  }
  0x47   : > { %s2270_s30 = smov [#allocation8]   ;;  %s2271_s18 = smov [#allocation11]  }
  0x48   : > { %s308_s11 = sshll.u32 %s2270_s30, 4  ;;  %s337_s22 = sshll.u32 %s2271_s18, 4  ;;  %s309_s11 = int_to_ptr.vmem [resolvable:$true] %s308_s11  ;;  %s2444_s22 = int_to_ptr.vmem [resolvable:$true] %s337_s22 }
  0x49   : > { %s2102_s27 = scalar_lea.hbm %s2689_s5, 1024 }
  0x4a   : > { %p2103_p6 = scmp.ne.s32.totalorder %s2689_s5, %s2102_s27  ;;  %p2109_p5 = scmp.lt.u32.totalorder %s2102_s27, %s2689_s5 }
  0x4c   : > { %p2105_p10 = pnand %p2103_p6, %p2397_p13 }
  0x4e   : > { %p2106_p3 = pneg %p2105_p10 }
  0x50   : > { %p2111_p7 = pnand %p2109_p5, %p2106_p3 }
  0x52   : > { %2114 = shalt.err (!%p2111_p7)
}
  0x53   : > { %s2115_s20 = scalar_lea.vmem %s309_s11, 1024  ;;  %p2123_p1 = scmp.lt.s32.totalorder %s309_s11, %s309_s11 }
  0x54   : > { %p2116_p9 = scmp.ne.s32.totalorder %s309_s11, %s2115_s20  ;;  %p2124_p2 = scmp.lt.s32.totalorder %s2115_s20, %s2115_s20 }
  0x56   : > { %p2118_p12 = pnand %p2116_p9, %p2397_p13  ;;  %p2125_p4 = por %p2124_p2, %p2123_p1 }
  0x58   : > { %p2119_p0 = pneg %p2118_p12 }
  0x5a   : > { %p2126_p8 = pnand %p2125_p4, %p2119_p0 }
  0x5c   : > { %2129 = shalt.err (!%p2126_p8)
}
  0x5d   : > { %s2715_s1 = smov 8   ;;  %s2716_s28 = smov 128  }
  0x5e   : > { %1966 = dma.hbm_to_vmem [thread:$0]  (!%p2383_p11), %s2689_s5, 1024, %s309_s11, [#allocation7], %s2716_s28, %s2716_s28, %s2715_s1  }
  0x5f   : > { %s2130_s18 = scalar_lea.hbm %s2692_s8, 4096 }
  0x60   : > { %p2131_p6 = scmp.ne.s32.totalorder %s2692_s8, %s2130_s18  ;;  %p2137_p10 = scmp.lt.u32.totalorder %s2130_s18, %s2692_s8 }
  0x62   : > { %p2133_p4 = pnand %p2131_p6, %p2397_p13 }
  0x64   : > { %p2134_p8 = pneg %p2133_p4 }
  0x66   : > { %p2139_p3 = pnand %p2137_p10, %p2134_p8 }
  0x68   : > { %2142 = shalt.err (!%p2139_p3)
}
  0x69   : > { %s2143_s11 = scalar_lea.vmem %s2444_s22, 4096  ;;  %p2151_p12 = scmp.lt.s32.totalorder %s2444_s22, %s2444_s22 }
  0x6a   : > { %p2144_p5 = scmp.ne.s32.totalorder %s2444_s22, %s2143_s11  ;;  %p2152_p0 = scmp.lt.s32.totalorder %s2143_s11, %s2143_s11 }
  0x6c   : > { %p2146_p7 = pnand %p2144_p5, %p2397_p13  ;;  %p2153_p1 = por %p2152_p0, %p2151_p12 }
  0x6e   : > { %p2147_p9 = pneg %p2146_p7 }
  0x70   : > { %p2154_p2 = pnand %p2153_p1, %p2147_p9 }
  0x72   : > { %2157 = shalt.err (!%p2154_p2)
}
  0x73   : > { %1972 = dma.hbm_to_vmem [thread:$0]  (!%p2383_p11), %s2692_s8, 4096, %s2444_s22, [#allocation10], %s2716_s28, %s2716_s28, %s2715_s1  }
  0x74   : > { %s2494_s24 = sadd.s32 1, %s2262_s16   ;;  %s35_s27 = sadd.s32 1, %s2258_s15 }
  0x75   : > { %s32_s12 = ssub.s32 %s2262_s16, %s2494_s24  ;;  %p42_p6 = scmp.ne.s32.totalorder %s2258_s15, %s2254_s14 }
  0x76   : > { %p33_p13 = scmp.eq.s32.totalorder %s32_s12, 0  ;;  %p43_p4 = scmp.eq.s32.totalorder %s2262_s16, 0 }
  0x77   : > { %p2717_p10 = scmp.eq.s32.totalorder %s2353_s17, 1  ;;  %p1985_p5 = scmp.lt.s32.totalorder %s2262_s16, 2 }
  0x78   : > { %s2503_s29 = scalar_select %p33_p13, %s2258_s15, %s35_s27  }
  0x79   : > { %p44_p8 = por %p43_p4, %p42_p6  ;;  %p2507_p3 = por %p2717_p10, %p42_p6 }
  0x7a   : > { %s354_s18 = sand.u32 1, %s2258_s15   ;;  %s1529_s22 = sshll.u32 %s2262_s16, 8 }
  0x7b   : > { %s1494_s25 = sshll.u32 %s354_s18, 4  ;;  %s2517_s26 = scalar_lea.hbm %s2684_s0, %s1529_s22 }
  0x7c   : > { %s358_s11 = scalar_lea.vmem [#allocation3], %s1494_s25  ;;  %p2521_p11 = pnand %p1985_p5, %p44_p8 }
  0x7d   : > { %s365_s20 = sshll.u32 %s358_s11, 4  ;;  %s2525_s12 = scalar_lea.sflag [#allocation4], %s354_s18  ;;  %s2519_s20 = int_to_ptr.vmem [resolvable:$true] %s365_s20 }
  0x7e   : > { %s2158_s27 = scalar_lea.hbm %s2517_s26, 256  ;;  %p2160_p9 = pneg %p2521_p11 }
  0x7f   : > { %p2159_p7 = scmp.ne.s32.totalorder %s2517_s26, %s2158_s27  ;;  %s2163_s23 = scalar_lea.hbm %s2684_s0, 512 }
  0x80   : > { %p2164_p1 = scmp.lt.u32.totalorder %s2517_s26, %s2684_s0  ;;  %p2165_p2 = scmp.lt.u32.totalorder %s2163_s23, %s2158_s27 }
  0x81   : > { %p2161_p12 = pnand %p2160_p9, %p2159_p7  ;;  %p2167_p6 = scmp.lt.u32.totalorder %s2158_s27, %s2517_s26 }
  0x82   : > { %p2166_p13 = por %p2165_p2, %p2164_p1 }
  0x83   : > { %p2162_p0 = pneg %p2161_p12 }
  0x84   : > { %p2168_p4 = por %p2167_p6, %p2166_p13 }
  0x86   : > { %p2169_p8 = pnand %p2168_p4, %p2162_p0 }
  0x88   : > { %2172 = shalt.err (!%p2169_p8)
}
  0x89   : > { %s2173_s18 = scalar_lea.vmem %s2519_s20, 256  ;;  %s2272_s25 = smov [#allocation3]  }
  0x8a   : > { %p2174_p10 = scmp.ne.s32.totalorder %s2519_s20, %s2173_s18  ;;  %s2178_s22 = sshll.u32 %s2272_s25, 4  ;;  %s2179_s22 = int_to_ptr.vmem [resolvable:$false] %s2178_s22 }
  0x8b   : > { %s2180_s13 = scalar_lea.vmem %s2179_s22, 512  ;;  %p2181_p12 = scmp.lt.s32.totalorder %s2519_s20, %s2179_s22 }
  0x8c   : > { %p2176_p5 = pnand %p2174_p10, %p2160_p9  ;;  %p2182_p1 = scmp.lt.s32.totalorder %s2180_s13, %s2173_s18 }
  0x8e   : > { %p2177_p7 = pneg %p2176_p5  ;;  %p2183_p2 = por %p2182_p1, %p2181_p12 }
  0x90   : > { %p2184_p13 = pnand %p2183_p2, %p2177_p7 }
  0x92   : > { %2187 = shalt.err (!%p2184_p13)
}
  0x93   : > { %1976 = dma.hbm_to_vmem [thread:$0]  (!%p2521_p11), %s2517_s26, 256, %s2519_s20, %s2525_s12, %s2716_s28, %s2716_s28, %s2715_s1  }
  0x94   : > { %p2720_p9 = scmp.ne.s32.totalorder %s2711_s21, 0 }
  0x95   : > { %s2559_s27 = sand.u32 (!%p2720_p9), 1, %s2254_s14   ;;  %p2721_p0 = scmp.ne.s32.totalorder (!%p2720_p9), %s2708_s19, 0 }
  0x96   : > { %377 = sbr.rel (%p2720_p9) target bundleno = 1383 (0x567), region = 60  ;;  %s1498_s23 = sshll.u32 (!%p2720_p9), %s2559_s27, 4 }
  0x97   : > { %s380_s11 = scalar_lea.sflag (!%p2720_p9), [#allocation4], %s2559_s27  ;;  %s383_s10 = scalar_lea.vmem (!%p2720_p9), [#allocation3], %s1498_s23 }
  0x9d   : > { %2233 = dma.done.wait (%p2721_p0), %s380_s11, 256  }
  0x9e   : > { %2235 = vsyncadd (%p2721_p0), %s380_s11, 4294967040  ;;  %p2722_p11 = scmp.eq.s32.totalorder %s2353_s17, 0 }
  0xa0   : > { %2237 = dma.done.wait (%p2722_p11), [#allocation7], 6144   ;;  %p2723_p6 = pmov %p2722_p11 }
  0xa2   : > { %2239 = vsyncadd (%p2723_p6), [#allocation7], 4294961152  ;;  %p2724_p4 = pmov %p2723_p6 }
  0xa4   : > { %2241 = dma.done.wait (%p2724_p4), [#allocation10], 6144   ;;  %p2725_p8 = pmov %p2724_p4 }
  0xa5   : > { %vm437_vm0 = vcmask 517120   ;;  %v2273_v0 = vmov 0.0   ;;  %v458_v1 = vld [vmem:[#allocation6 + $0x40] sm:$0xff]  ;;  %v459_v2 = vld [vmem:[#allocation6 + $0x48] sm:$0xff]  ;;  %v460_v3 = vld [vmem:[#allocation6 + $0x50] sm:$0xff]  ;;  %vm442_vm1 = vcmask 523264  }
  0xa6   : > { %2243 = vsyncadd (%p2725_p8), [#allocation10], 4294961152  ;;  %438 = vst.msk [vmem:[#allocation2] sm:$0x3] %vm437_vm0, %v2273_v0  ;;  %v1772_v4 = vpack.c.bf16 %v459_v2, %v458_v1  ;;  %v461_v5 = vld [vmem:[#allocation6 + $0x58] sm:$0xff]  ;;  %v462_v7 = vld [vmem:[#allocation6 + $0x60] sm:$0xff] }
  0xa7   : > { %439 = vst.msk [vmem:[#allocation2 + $0x12] sm:$0x3] %vm437_vm0, %v2273_v0  ;;  %v1776_v6 = vpack.c.bf16 %v461_v5, %v460_v3  ;;  %v463_v8 = vld [vmem:[#allocation6 + $0x68] sm:$0xff]  ;;  %v440_v9 = vld [vmem:[%s383_s10] sm:$0xff]  ;;  %v465_v13 = vld [vmem:[#allocation6 + $0x78] sm:$0xff]  ;;  %s435_s13 = scalar_lea.vmem [#allocation12], %s1498_s23 }
  0xa8   : > { %1773 = vmatprep.subr.bf16.mxu0 %v1772_v4  ;;  %443 = vst.msk [vmem:[#allocation2 + $0x2] sm:$0xff] %vm442_vm1, %v440_v9  ;;  %v441_v10 = vld [vmem:[%s383_s10 + $0x8] sm:$0xff]  ;;  %v1780_v11 = vpack.c.bf16 %v463_v8, %v462_v7  ;;  %v464_v12 = vld [vmem:[#allocation6 + $0x70] sm:$0xff]  ;;  %v447_v16 = vld [vmem:[#allocation6] sm:$0xff]  ;;  %s1376_s11 = sshll.u32 %s435_s13, 4  ;;  %s1530_s10 = sshll.u32 %s2353_s17, 8  ;;  %s2635_s11 = int_to_ptr.vmem [resolvable:$true] %s1376_s11 }
  0xa9   : > { %1775 = vmatpush3.bf16.msra.mxu0 %v1772_v4  ;;  %444 = vst.msk [vmem:[#allocation2 + $0xa] sm:$0xff] %vm442_vm1, %v441_v10  ;;  %v1784_v14 = vpack.c.bf16 %v465_v13, %v464_v12  ;;  %v448_v17 = vld [vmem:[#allocation6 + $0x8] sm:$0xff]  ;;  %v449_v19 = vld [vmem:[#allocation6 + $0x10] sm:$0xff]  ;;  %v450_v20 = vld [vmem:[#allocation6 + $0x18] sm:$0xff]  ;;  %s2726_s1 = sld [smem:[#allocation20_spill]]  ;;  %s1363_s23 = scalar_lea.sflag [#allocation5], %s2559_s27 }
  0xaa   : > { %1777 = vmatprep.subr.bf16.mxu0 %v1776_v6  ;;  %v1788_v18 = vpack.c.bf16 %v448_v17, %v447_v16  ;;  %v451_v22 = vld [vmem:[#allocation6 + $0x20] sm:$0xff]  ;;  %v1792_v23 = vpack.c.bf16 %v450_v20, %v449_v19  ;;  %v920_v26 = vld [vmem:[#allocation8 + $0x8] sm:$0xff]  ;;  %v921_v29 = vld [vmem:[#allocation8 + $0x10] sm:$0xff]  ;;  %s2188_s26 = scalar_lea.vmem %s2635_s11, 256  ;;  %s2274_s17 = smov [#allocation12]  }
  0xab   : > { %v919_v25 = vld [vmem:[#allocation8] sm:$0xff]  ;;  %v452_v27 = vld [vmem:[#allocation6 + $0x28] sm:$0xff]  ;;  %v922_v30 = vld [vmem:[#allocation8 + $0x18] sm:$0xff]  ;;  %p2189_p10 = scmp.ne.s32.totalorder %s2635_s11, %s2188_s26  ;;  %s2192_s20 = sshll.u32 %s2274_s17, 4  ;;  %s2193_s20 = int_to_ptr.vmem [resolvable:$false] %s2192_s20 }
  0xac   : > { %v2582_v28 = vpack.c.bf16 %v920_v26, %v919_v25  ;;  %v2585_v31 = vpack.c.bf16 %v922_v30, %v921_v29  ;;  %v923_v32 = vld [vmem:[#allocation8 + $0x20] sm:$0xff]  ;;  %v924_v33 = vld [vmem:[#allocation8 + $0x28] sm:$0xff]  ;;  %v1796_v34 = vpack.c.bf16 %v452_v27, %v451_v22  ;;  %v453_v35 = vld [vmem:[#allocation6 + $0x30] sm:$0xff]  ;;  %s2194_s12 = scalar_lea.vmem %s2193_s20, 512  ;;  %p2195_p12 = scmp.lt.s32.totalorder %s2635_s11, %s2193_s20 }
  0xad   : > { %1779 = vmatpush3.bf16.msra.mxu0 %v1776_v6  ;;  %v454_v36 = vld [vmem:[#allocation6 + $0x38] sm:$0xff]  ;;  %v2591_v37 = vpack.c.bf16 %v924_v33, %v923_v32  ;;  %v631_v39 = vld [vmem:[#allocation6 + $0x80] sm:$0xff]  ;;  %v632_v40 = vld [vmem:[#allocation6 + $0x88] sm:$0xff]  ;;  %p2190_p5 = pnand %p2189_p10, %p2507_p3  ;;  %p2196_p1 = scmp.lt.s32.totalorder %s2194_s12, %s2188_s26 }
  0xae   : > { %1781 = vmatprep.subr.bf16.mxu0 %v1780_v11  ;;  %1853 = vmatprep.subr.bf16.mxu1 %v2582_v28  ;;  %v1800_v38 = vpack.c.bf16 %v454_v36, %v453_v35  ;;  %v1804_v41 = vpack.c.bf16 %v632_v40, %v631_v39  ;;  %v633_v42 = vld [vmem:[#allocation6 + $0x90] sm:$0xff]  ;;  %v634_v43 = vld [vmem:[#allocation6 + $0x98] sm:$0xff]  ;;  %v635_v47 = vld [vmem:[#allocation6 + $0xa0] sm:$0xff] }
  0xaf   : > { %v455_v15 = vld [vmem:[#allocation2 + $0x1] sm:$0xff]  ;;  %1855 = vmatpush3.bf16.msra.mxu1 %v2582_v28  ;;  %v1808_v45 = vpack.c.bf16 %v634_v43, %v633_v42  ;;  %v638_v51 = vld [vmem:[#allocation6 + $0xb8] sm:$0xff]  ;;  %v725_v53 = vld [vmem:[#allocation6 + $0xc0] sm:$0xff]  ;;  %s2640_s28 = scalar_lea.hbm %s2726_s1, %s1530_s10  ;;  %p2191_p7 = pneg %p2190_p5 }
  0xb0   : > { %1655 = vmatprep.mubr.msk.f32.mxu0 %vm442_vm1, %v455_v15  ;;  %v456_v21 = vld [vmem:[#allocation2 + $0x9] sm:$0xff]  ;;  %v445_v24 = vld [vmem:[#allocation2] sm:$0xff]  ;;  %1857 = vmatprep.subr.bf16.mxu1 %v2585_v31  ;;  %v729_v61 = vld [vmem:[#allocation6 + $0xe0] sm:$0xff]  ;;  %p2197_p2 = por %p2196_p1, %p2195_p12 }
  0xb1   : > { %1783 = vmatpush3.bf16.msra.mxu0 %v1780_v11  ;;  %v446_v44 = vld [vmem:[#allocation2 + $0x8] sm:$0xff]  ;;  %v636_v48 = vld [vmem:[#allocation6 + $0xa8] sm:$0xff]  ;;  %v728_v57 = vld [vmem:[#allocation6 + $0xd8] sm:$0xff] }
  0xb2   : > { %1785 = vmatprep.subr.bf16.mxu0 %v1784_v14  ;;  %v628_v46 = vld [vmem:[#allocation2 + $0x2] sm:$0xff]  ;;  %v1812_v49 = vpack.c.bf16 %v636_v48, %v635_v47  ;;  %v629_v58 = vld [vmem:[#allocation2 + $0xa] sm:$0xff]  ;;  %v819_v4 = vld [vmem:[#allocation6 + $0x100] sm:$0xff]  ;;  %p2198_p13 = pnand %p2197_p2, %p2191_p7 }
  0xb3   : > { %1859 = vmatpush3.bf16.msra.mxu1 %v2585_v31  ;;  %v637_v50 = vld [vmem:[#allocation6 + $0xb0] sm:$0xff]  ;;  %v726_v54 = vld [vmem:[#allocation6 + $0xc8] sm:$0xff]  ;;  %v732_v2 = vld [vmem:[#allocation6 + $0xf8] sm:$0xff] }
  0xb4   : > { %1861 = vmatprep.subr.bf16.mxu1 %v2591_v37  ;;  %v1816_v52 = vpack.c.bf16 %v638_v51, %v637_v50  ;;  %v1820_v55 = vpack.c.bf16 %v726_v54, %v725_v53  ;;  %v727_v56 = vld [vmem:[#allocation6 + $0xd0] sm:$0xff]  ;;  %v730_v62 = vld [vmem:[#allocation6 + $0xe8] sm:$0xff]  ;;  %v822_v8 = vld [vmem:[#allocation6 + $0x118] sm:$0xff] }
  0xb5   : > { %1787 = vmatpush3.bf16.msra.mxu0 %v1784_v14  ;;  %v1824_v59 = vpack.c.bf16 %v728_v57, %v727_v56  ;;  %v722_v60 = vld [vmem:[#allocation2 + $0x3] sm:$0xff]  ;;  %v1828_v63 = vpack.c.bf16 %v730_v62, %v729_v61  ;;  %v723_v9 = vld [vmem:[#allocation2 + $0xb] sm:$0xff]  ;;  %v823_v12 = vld [vmem:[#allocation6 + $0x120] sm:$0xff] }
  0xb6   : > { %1789 = vmatprep.subr.bf16.mxu0 %v1788_v18  ;;  %v731_v1 = vld [vmem:[#allocation6 + $0xf0] sm:$0xff]  ;;  %v820_v5 = vld [vmem:[#allocation6 + $0x108] sm:$0xff]  ;;  %v826_v16 = vld [vmem:[#allocation6 + $0x138] sm:$0xff] }
  0xb7   : > { %1863 = vmatpush3.bf16.msra.mxu1 %v2591_v37  ;;  %v1832_v3 = vpack.c.bf16 %v732_v2, %v731_v1  ;;  %v1836_v6 = vpack.c.bf16 %v820_v5, %v819_v4  ;;  %v821_v7 = vld [vmem:[#allocation6 + $0x110] sm:$0xff]  ;;  %v824_v13 = vld [vmem:[#allocation6 + $0x128] sm:$0xff]  ;;  %v926_v20 = vld [vmem:[#allocation8 + $0x38] sm:$0xff] }
  0xb8   : > { %1656 = vmatmul.mubr.msk.f32.vlgmr.msra.gmra.mrb[0].mxu0 %vm442_vm1, %v456_v21  ;;  %v1840_v10 = vpack.c.bf16 %v822_v8, %v821_v7  ;;  %v816_v11 = vld [vmem:[#allocation2 + $0x4] sm:$0xff]  ;;  %v1844_v14 = vpack.c.bf16 %v824_v13, %v823_v12  ;;  %v1514_v22 = vld [vmem:[%s2686_s2] ss:$0 sm:$0xff]  ;;  %v1115_v36 = vld [vmem:[#allocation9] sm:$0xff] }
  0xb9   : > { %1791 = vmatpush3.bf16.msra.mxu0 %v1788_v18  ;;  %1674 = vmatprep.mubr.msk.f32.mxu0 %vm442_vm1, %v445_v24  ;;  %v825_v15 = vld [vmem:[#allocation6 + $0x130] sm:$0xff]  ;;  %v1120_v39 = vld [vmem:[#allocation9 + $0x28] sm:$0xff]  ;;  %v1122_v40 = vld [vmem:[#allocation9 + $0x38] sm:$0xff] }
  0xba   : > { %1793 = vmatprep.subr.bf16.mxu0 %v1792_v23  ;;  %v1848_v17 = vpack.c.bf16 %v826_v16, %v825_v15  ;;  %v817_v18 = vld [vmem:[#allocation2 + $0xc] sm:$0xff]  ;;  %v1119_v42 = vld [vmem:[#allocation9 + $0x20] sm:$0xff]  ;;  %v1128_v51 = vld [vmem:[#allocation9 + $0x68] sm:$0xff] }
  0xbb   : > { %v925_v19 = vld [vmem:[#allocation8 + $0x30] sm:$0xff]  ;;  %v1123_v48 = vld [vmem:[#allocation9 + $0x40] sm:$0xff]  ;;  %v1247_v7 = vld [vmem:[#allocation11 + $0x8] sm:$0xff] }
  0xbc   : > { %v1864_v21 = vpack.c.bf16 %v926_v20, %v925_v19  ;;  %v1121_v43 = vld [vmem:[#allocation9 + $0x30] sm:$0xff]  ;;  %v1127_v54 = vld [vmem:[#allocation9 + $0x60] sm:$0xff]  ;;  %v1520_v8 = vld [vmem:[%s2688_s4] ss:$0 sm:$0xff] }
  0xbd   : > { %1795 = vmatpush3.bf16.msra.mxu0 %v1792_v23  ;;  %v1262_v57 = vld [vmem:[#allocation11 + $0x80] sm:$0xff]  ;;  %v1248_v16 = vld [vmem:[#allocation11 + $0x10] sm:$0xff]  ;;  %v1267_v19 = vld [vmem:[#allocation11 + $0xa8] sm:$0xff] }
  0xbe   : > { %1797 = vmatprep.subr.bf16.mxu0 %v1796_v34  ;;  %1865 = vmatprep.subr.bf16.mxu1 %v1864_v21 }
  0xbf   : > { %1867 = vmatpush3.bf16.msra.mxu1 %v1864_v21 }
  0xc0   : > { %1869 = vmatprep.subr.bf16.mxu1 %v2582_v28 }
  0xc1   : > { %1799 = vmatpush3.bf16.msra.mxu0 %v1796_v34 }
  0xc2   : > { %1801 = vmatprep.subr.bf16.mxu0 %v1800_v38 }
  0xc5   : > { %1803 = vmatpush3.bf16.msra.mxu0 %v1800_v38  ;;  %v1117_v38 = vld [vmem:[#allocation9 + $0x10] sm:$0xff] }
  0xc6   : > { %1805 = vmatprep.subr.bf16.mxu0 %v1804_v41 }
  0xc8   : > { %1675 = vmatmul.mubr.msk.f32.vlgmr.msra.gmra.mrb[0].mxu0 %vm442_vm1, %v446_v44  ;;  %v1890_v44 = vpack.c.bf16 %v1121_v43, %v1119_v42  ;;  %v1274_v43 = vld [vmem:[#allocation11 + $0xe0] sm:$0xff] }
  0xc9   : > { %1807 = vmatpush3.bf16.msra.mxu0 %v1804_v41  ;;  %1693 = vmatprep.mubr.msk.f32.mxu0 %vm442_vm1, %v628_v46  ;;  %v1888_v41 = vpack.c.bf16 %v1122_v40, %v1120_v39  ;;  %v1126_v46 = vld [vmem:[#allocation9 + $0x58] sm:$0xff]  ;;  %v1256_v40 = vld [vmem:[#allocation11 + $0x50] sm:$0xff] }
  0xca   : > { %1809 = vmatprep.subr.bf16.mxu0 %v1808_v45 }
  0xcd   : > { %1811 = vmatpush3.bf16.msra.mxu0 %v1808_v45  ;;  %v1124_v45 = vld [vmem:[#allocation9 + $0x48] sm:$0xff] }
  0xce   : > { %1813 = vmatprep.subr.bf16.mxu0 %v1812_v49  ;;  %v1892_v47 = vpack.c.bf16 %v1126_v46, %v1124_v45  ;;  %v1258_v46 = vld [vmem:[#allocation11 + $0x60] sm:$0xff] }
  0xd1   : > { %1815 = vmatpush3.bf16.msra.mxu0 %v1812_v49  ;;  %v1125_v49 = vld [vmem:[#allocation9 + $0x50] sm:$0xff] }
  0xd2   : > { %1817 = vmatprep.subr.bf16.mxu0 %v1816_v52  ;;  %v1894_v50 = vpack.c.bf16 %v1125_v49, %v1123_v48  ;;  %v1276_v49 = vld [vmem:[#allocation11 + $0xf0] sm:$0xff] }
  0xd5   : > { %1819 = vmatpush3.bf16.msra.mxu0 %v1816_v52  ;;  %v1130_v52 = vld [vmem:[#allocation9 + $0x78] sm:$0xff] }
  0xd6   : > { %1821 = vmatprep.subr.bf16.mxu0 %v1820_v55  ;;  %v1896_v53 = vpack.c.bf16 %v1130_v52, %v1128_v51  ;;  %v1260_v52 = vld [vmem:[#allocation11 + $0x70] sm:$0xff] }
  0xd8   : > { %1694 = vmatmul.mubr.msk.f32.vlgmr.msra.gmra.mrb[0].mxu0 %vm442_vm1, %v629_v58  ;;  %v1263_v58 = vld [vmem:[#allocation11 + $0x88] sm:$0xff] }
  0xd9   : > { %1823 = vmatpush3.bf16.msra.mxu0 %v1820_v55  ;;  %1712 = vmatprep.mubr.msk.f32.mxu0 %vm442_vm1, %v722_v60  ;;  %v1129_v55 = vld [vmem:[#allocation9 + $0x70] sm:$0xff] }
  0xda   : > { %1825 = vmatprep.subr.bf16.mxu0 %v1824_v59  ;;  %v1898_v56 = vpack.c.bf16 %v1129_v55, %v1127_v54  ;;  %v1133_v55 = vlaneseq }
  0xdd   : > { %1827 = vmatpush3.bf16.msra.mxu0 %v1824_v59  ;;  %v1900_v59 = vpack.c.bf16 %v1263_v58, %v1262_v57  ;;  %v1131_v58 = vld [vmem:[%s2691_s7] sm:$0x3] }
  0xde   : > { %1829 = vmatprep.subr.bf16.mxu0 %v1828_v63 }
  0xe1   : > { %1831 = vmatpush3.bf16.msra.mxu0 %v1828_v63 }
  0xe2   : > { %1833 = vmatprep.subr.bf16.mxu0 %v1832_v3 }
  0xe5   : > { %1835 = vmatpush3.bf16.msra.mxu0 %v1832_v3  ;;  %v1519_v3 = vld [vmem:[%s2687_s3] ss:$0 sm:$0xff] }
  0xe6   : > { %1837 = vmatprep.subr.bf16.mxu0 %v1836_v6 }
  0xe8   : > { %1713 = vmatmul.mubr.msk.f32.vlgmr.msra.gmra.mrb[0].mxu0 %vm442_vm1, %v723_v9  ;;  %v1264_v9 = vld [vmem:[#allocation11 + $0x90] sm:$0xff] }
  0xe9   : > { %1839 = vmatpush3.bf16.msra.mxu0 %v1836_v6  ;;  %1731 = vmatprep.mubr.msk.f32.mxu0 %vm442_vm1, %v816_v11  ;;  %v1246_v6 = vld [vmem:[#allocation11] sm:$0xff] }
  0xea   : > { %1841 = vmatprep.subr.bf16.mxu0 %v1840_v10  ;;  %v1902_v12 = vpack.c.bf16 %v1247_v7, %v1246_v6 }
  0xed   : > { %1843 = vmatpush3.bf16.msra.mxu0 %v1840_v10  ;;  %v1265_v10 = vld [vmem:[#allocation11 + $0x98] sm:$0xff] }
  0xee   : > { %1845 = vmatprep.subr.bf16.mxu0 %v1844_v14  ;;  %v1904_v15 = vpack.c.bf16 %v1265_v10, %v1264_v9 }
  0xf1   : > { %1847 = vmatpush3.bf16.msra.mxu0 %v1844_v14 }
  0xf2   : > { %1849 = vmatprep.subr.bf16.mxu0 %v1848_v17 }
  0xf5   : > { %1851 = vmatpush3.bf16.msra.mxu0 %v1848_v17  ;;  %v1249_v17 = vld [vmem:[#allocation11 + $0x18] sm:$0xff] }
  0xf6   : > { %v1906_v20 = vpack.c.bf16 %v1249_v17, %v1248_v16 }
  0xf8   : > { %1732 = vmatmul.mubr.msk.f32.vlgmr.msra.gmra.mrb[0].mxu0 %vm442_vm1, %v817_v18  ;;  %v1266_v18 = vld [vmem:[#allocation11 + $0xa0] sm:$0xff] }
 0x1cb   : > { %v1733_v23 = vpop.f32.mrb[0].mxu0 }
 0x1cc   : > { %v899_v24 = vpop.f32.mrb[1].mxu0  ;;  %v918_v26 = vadd.f32 %v1733_v23, %v1514_v22  ;;  %v1250_v23 = vld [vmem:[#allocation11 + $0x20] sm:$0xff] }
 0x1cd   : > { %v917_v25 = vadd.f32 %v1514_v22, %v899_v24  ;;  %v1908_v22 = vpack.c.bf16 %v1267_v19, %v1266_v18  ;;  %v1251_v24 = vld [vmem:[#allocation11 + $0x28] sm:$0xff] }
 0x1cf   : > { %1750 = vmatprep.mubr.msk.f32.mxu1 %vm442_vm1, %v917_v25 }
 0x1d0   : > { %1751 = vmatmul.mubr.msk.f32.vlgmr.msra.gmra.mrb[0].mxu1 %vm442_vm1, %v918_v26 }
 0x1d1   : > { %1871 = vmatpush3.bf16.msra.mxu1 %v2582_v28  ;;  %v1116_v28 = vld [vmem:[#allocation9 + $0x8] sm:$0xff] }
 0x1d2   : > { %1873 = vmatprep.subr.bf16.mxu1 %v2585_v31 }
 0x1d5   : > { %1875 = vmatpush3.bf16.msra.mxu1 %v2585_v31  ;;  %v1118_v31 = vld [vmem:[#allocation9 + $0x18] sm:$0xff] }
 0x1d6   : > { %1877 = vmatprep.subr.bf16.mxu1 %v2591_v37  ;;  %v1884_v35 = vpack.c.bf16 %v1118_v31, %v1116_v28  ;;  %v1254_v31 = vld [vmem:[#allocation11 + $0x40] sm:$0xff] }
 0x1d9   : > { %1879 = vmatpush3.bf16.msra.mxu1 %v2591_v37  ;;  %v1886_v37 = vpack.c.bf16 %v1117_v38, %v1115_v36  ;;  %v1272_v38 = vld [vmem:[#allocation11 + $0xd0] sm:$0xff] }
 0x1da   : > { %1881 = vmatprep.subr.bf16.mxu1 %v1864_v21 }
 0x1dd   : > { %1883 = vmatpush3.bf16.msra.mxu1 %v1864_v21 }
 0x1de   : > { %1885 = vmatprep.subr.bf16.mxu1 %v1884_v35  ;;  %v1255_v35 = vld [vmem:[#allocation11 + $0x48] sm:$0xff] }
 0x1df   : > { %v1918_v36 = vpack.c.bf16 %v1255_v35, %v1254_v31 }
 0x2a3   : > { %v1752_v27 = vpop.f32.mrb[0].mxu1 }
 0x2a4   : > { %v1009_v29 = vsub.f32 %v918_v26, %v1752_v27  ;;  %v999_v30 = vpop.f32.mrb[1].mxu1  ;;  %v1268_v26 = vld [vmem:[#allocation11 + $0xb0] sm:$0xff]  ;;  %v1269_v27 = vld [vmem:[#allocation11 + $0xb8] sm:$0xff] }
 0x2a5   : > { %v1008_v32 = vsub.f32 %v917_v25, %v999_v30  ;;  %v1910_v25 = vpack.c.bf16 %v1251_v24, %v1250_v23  ;;  %v1252_v30 = vld [vmem:[#allocation11 + $0x30] sm:$0xff] }
 0x2a6   : > { %v1011_v34 = vmul.f32 %v1009_v29, %v1009_v29 }
 0x2a7   : > { %v1010_v33 = vmul.f32 %v1008_v32, %v1008_v32 }
 0x2a9   : > { %1769 = vmatprep.mubr.msk.f32.mxu1 %vm442_vm1, %v1010_v33 }
 0x2aa   : > { %1770 = vmatmul.mubr.msk.f32.vlgmr.msra.gmra.mrb[2].mxu1 %vm442_vm1, %v1011_v34  ;;  %v1271_v34 = vld [vmem:[#allocation11 + $0xc8] sm:$0xff] }
 0x2ab   : > { %1213 = vmatprep.mubr.f32.mxu1 %v2273_v0  ;;  %1887 = vmatpush1.bf16.msra.mxu1 %v1886_v37  ;;  %v1273_v37 = vld [vmem:[#allocation11 + $0xd8] sm:$0xff] }
 0x2ac   : > { %1889 = vmatprep.subr.bf16.mxu1 %v1888_v41  ;;  %v1920_v39 = vpack.c.bf16 %v1273_v37, %v1272_v38  ;;  %v1257_v41 = vld [vmem:[#allocation11 + $0x58] sm:$0xff] }
 0x2ad   : > { %v1922_v42 = vpack.c.bf16 %v1257_v41, %v1256_v40 }
 0x2af   : > { %1891 = vmatpush1.bf16.msra.mxu1 %v1890_v44  ;;  %v1275_v44 = vld [vmem:[#allocation11 + $0xe8] sm:$0xff] }
 0x2b0   : > { %1893 = vmatprep.subr.bf16.mxu1 %v1892_v47  ;;  %v1924_v45 = vpack.c.bf16 %v1275_v44, %v1274_v43  ;;  %v1259_v47 = vld [vmem:[#allocation11 + $0x68] sm:$0xff] }
 0x2b1   : > { %v1926_v48 = vpack.c.bf16 %v1259_v47, %v1258_v46 }
 0x2b3   : > { %1895 = vmatpush1.bf16.msra.mxu1 %v1894_v50  ;;  %v1277_v50 = vld [vmem:[#allocation11 + $0xf8] sm:$0xff] }
 0x2b4   : > { %1897 = vmatprep.subr.bf16.mxu1 %v1896_v53  ;;  %v1928_v51 = vpack.c.bf16 %v1277_v50, %v1276_v49  ;;  %v1261_v53 = vld [vmem:[#allocation11 + $0x78] sm:$0xff] }
 0x2b5   : > { %v1930_v54 = vpack.c.bf16 %v1261_v53, %v1260_v52 }
 0x2b7   : > { %1899 = vmatpush1.bf16.msra.mxu1 %v1898_v56  ;;  %v1134_v56 = vshrl.u32 %v1133_v55, 7 }
 0x2b8   : > { %1901 = vmatprep.subr.bf16.mxu1 %v1900_v59 }
 0x2b9   : > { %v1135_v57 = vsub.s32 0, %v1134_v56  ;;  %v1139_v59 = vsub.s32 1, %v1134_v56 }
 0x37d   : > { %v1771_v60 = vpop.f32.mrb[2].mxu1 }
 0x37e   : > { %v1090_v61 = vadd.f32 1e-06, %v1771_v60  ;;  %v1084_v62 = vpop.f32.mrb[3].mxu1  ;;  %v1136_v60 = vrot.slane %v1131_v58, %v1135_v57 }
 0x37f   : > { %v1085_v63 = vadd.f32 1e-06, %v1084_v62 }
 0x380   : > { %2034 = vrsqrt.f32 %v1090_v61  ;;  %v1140_v61 = vrot.slane %v1131_v58, %v1139_v59 }
 0x381   : > { %2036 = vrsqrt.f32 %v1085_v63 }
 0x38a   : > { %v2035_v1 = vpop.eup %2034 }
 0x38b   : > { %v2037_v2 = vpop.eup %2036  ;;  %v1096_v5 = vmul.f32 %v2035_v1, %v1009_v29  ;;  %v1912_v29 = vpack.c.bf16 %v1269_v27, %v1268_v26 }
 0x38c   : > { %v1095_v4 = vmul.f32 %v2037_v2, %v1008_v32  ;;  %v1253_v32 = vld [vmem:[#allocation11 + $0x38] sm:$0xff] }
 0x38d   : > { %v1105_v14 = vmul.f32 %v1519_v3, %v1096_v5  ;;  %v1914_v33 = vpack.c.bf16 %v1253_v32, %v1252_v30 }
 0x38e   : > { %v1104_v11 = vmul.f32 %v1519_v3, %v1095_v4 }
 0x38f   : > { %v1114_v21 = vadd.f32 %v1520_v8, %v1105_v14 }
 0x390   : > { %v1113_v13 = vadd.f32 %v1520_v8, %v1104_v11 }
 0x392   : > { %1521 = vmatmul.mubr.msk.f32.vlgmr.msra.gmra.mrb[4].mxu1 %vm442_vm1, %v1113_v13 }
 0x393   : > { %1219 = vmatprep.mubr.f32.mxu1 %v2273_v0  ;;  %1903 = vmatpush3.bf16.msra.mxu1 %v1902_v12  ;;  %v1270_v0 = vld [vmem:[#allocation11 + $0xc0] sm:$0xff] }
 0x394   : > { %1905 = vmatprep.subr.bf16.mxu1 %v1904_v15  ;;  %v1916_v28 = vpack.c.bf16 %v1271_v34, %v1270_v0 }
 0x396   : > { %1522 = vmatmul.mubr.msk.f32.gmra.mrb[6].mxu1 %vm442_vm1, %v1114_v21 }
 0x397   : > { %1907 = vmatpush3.bf16.msra.mxu1 %v1906_v20 }
 0x398   : > { %1909 = vmatprep.subr.bf16.mxu1 %v1908_v22 }
 0x39b   : > { %1911 = vmatpush3.bf16.msra.mxu1 %v1910_v25 }
 0x39c   : > { %1913 = vmatprep.subr.bf16.mxu1 %v1912_v29  ;;  %v1523_v29 = vld [vmem:[%s2693_s9] ss:$0 sm:$0xff] }
 0x39f   : > { %1915 = vmatpush3.bf16.msra.mxu1 %v1914_v33 }
 0x3a0   : > { %1917 = vmatprep.subr.bf16.mxu1 %v1916_v28 }
 0x3a3   : > { %1919 = vmatpush3.bf16.msra.mxu1 %v1918_v36 }
 0x3a4   : > { %1921 = vmatprep.subr.bf16.mxu1 %v1920_v39 }
 0x3a7   : > { %1923 = vmatpush3.bf16.msra.mxu1 %v1922_v42 }
 0x3a8   : > { %1925 = vmatprep.subr.bf16.mxu1 %v1924_v45 }
 0x3ab   : > { %1927 = vmatpush3.bf16.msra.mxu1 %v1926_v48 }
 0x3ac   : > { %1929 = vmatprep.subr.bf16.mxu1 %v1928_v51 }
 0x3af   : > { %1931 = vmatpush3.bf16.msra.mxu1 %v1930_v54 }
 0x465   : > { %v1215_v62 = vpop.f32.mrb[4].mxu1 }
 0x466   : > { %v1216_v63 = vadd.f32 %v1215_v62, %v1136_v60  ;;  %v1217_v1 = vpop.f32.mrb[5].mxu1 }
 0x467   : > { %v1218_v2 = vadd.f32 %v1217_v1, %v1140_v61 }
 0x468   : > { %v1230_v3 = vmul.f32 0.70710677, %v1216_v63  ;;  %v1226_v16 = vmul.f32 0.5, %v1216_v63 }
 0x469   : > { %v1231_v4 = vmul.f32 0.70710677, %v1218_v2  ;;  %v1221_v5 = vpop.f32.mrb[6].mxu1  ;;  %v1227_v14 = vmul.f32 0.5, %v1218_v2 }
 0x46a   : > { %2038 = verf.f32 %v1230_v3  ;;  %v1222_v6 = vadd.f32 %v1221_v5, %v1136_v60  ;;  %v1223_v7 = vpop.f32.mrb[7].mxu1 }
 0x46b   : > { %2040 = verf.f32 %v1231_v4  ;;  %v1224_v8 = vadd.f32 %v1223_v7, %v1140_v61 }
 0x46c   : > { %v1232_v9 = vmul.f32 0.70710677, %v1222_v6  ;;  %v1228_v24 = vmul.f32 0.5, %v1222_v6 }
 0x46d   : > { %v1233_v10 = vmul.f32 0.70710677, %v1224_v8  ;;  %v1229_v22 = vmul.f32 0.5, %v1224_v8 }
 0x46e   : > { %2042 = verf.f32 %v1232_v9 }
 0x46f   : > { %2044 = verf.f32 %v1233_v10 }
 0x474   : > { %v2039_v11 = vpop.eup %2038 }
 0x475   : > { %v2041_v12 = vpop.eup %2040  ;;  %v1238_v13 = vadd.f32 1.0, %v2039_v11 }
 0x476   : > { %v1239_v15 = vadd.f32 1.0, %v2041_v12 }
 0x477   : > { %v1242_v20 = vmul.f32 %v1238_v13, %v1226_v16 }
 0x478   : > { %v2043_v17 = vpop.eup %2042  ;;  %v1243_v18 = vmul.f32 %v1239_v15, %v1227_v14 }
 0x479   : > { %v2045_v19 = vpop.eup %2044  ;;  %v1240_v21 = vadd.f32 1.0, %v2043_v17 }
 0x47a   : > { %v1241_v23 = vadd.f32 1.0, %v2045_v19  ;;  %1349 = vmatprep.mubr.f32.mxu1 %v1243_v18 }
 0x47b   : > { %1350 = vmatmul.mubr.f32.vlgmr.msra.gmra.mrb[8].mxu1 %v1242_v20  ;;  %v1244_v26 = vmul.f32 %v1240_v21, %v1228_v24 }
 0x47c   : > { %v1245_v25 = vmul.f32 %v1241_v23, %v1229_v22 }
 0x47e   : > { %1354 = vmatprep.mubr.f32.mxu1 %v1245_v25 }
 0x47f   : > { %1355 = vmatmul.mubr.f32.gmra.mrb[10].mxu1 %v1244_v26 }
 0x54e   : > { %v1633_v27 = vpop.f32.mrb[8].mxu1 }
 0x54f   : > { %v1634_v30 = vpop.f32.mrb[9].mxu1 }
 0x550   : > { %v1635_v32 = vadd.f32 %v1634_v30, %v1633_v27 }
 0x552   : > { %v1352_v33 = vadd.f32 %v1635_v32, %v1523_v29  ;;  %v1636_v0 = vpop.f32.mrb[10].mxu1 }
 0x553   : > { %v1637_v34 = vpop.f32.mrb[11].mxu1 }
 0x554   : > { %1360 = vst [vmem:[%s435_s13] sm:$0xff] %v1352_v33  ;;  %v1638_v28 = vadd.f32 %v1637_v34, %v1636_v0 }
 0x556   : > { %v1357_v31 = vadd.f32 %v1638_v28, %v1523_v29 }
 0x558   : > { %1361 = vst [vmem:[%s435_s13 + $0x8] sm:$0xff] %v1357_v31 }
 0x559   : > { %2201 = shalt.err (!%p2198_p13)
}
 0x55a   : > { %s2202_s18 = scalar_lea.hbm %s2640_s28, 256  ;;  %s2206_s13 = scalar_lea.hbm %s2726_s1, 512 }
 0x55b   : > { %p2203_p9 = scmp.ne.s32.totalorder %s2640_s28, %s2202_s18  ;;  %p2207_p6 = scmp.lt.u32.totalorder %s2640_s28, %s2726_s1 }
 0x55c   : > { %p2208_p4 = scmp.lt.u32.totalorder %s2206_s13, %s2202_s18  ;;  %p2210_p10 = scmp.lt.u32.totalorder %s2202_s18, %s2640_s28 }
 0x55d   : > { %p2204_p0 = pnand %p2203_p9, %p2507_p3 }
 0x55e   : > { %p2209_p8 = por %p2208_p4, %p2207_p6 }
 0x55f   : > { %p2205_p11 = pneg %p2204_p0 }
 0x560   : > { %p2211_p5 = por %p2210_p10, %p2209_p8 }
 0x562   : > { %p2212_p7 = pnand %p2211_p5, %p2205_p11 }
 0x564   : > { %2215 = shalt.err (!%p2212_p7)
}
 0x565   : > { %s2275_s21 = smov 128   ;;  %s2276_s26 = smov 8  }
 0x566   : > { %1958 = dma.vmem_to_hbm [thread:$0]  (%p2507_p3), %s2635_s11, 256, %s2640_s28, %s1363_s23, %s2275_s21, %s2275_s21, %s2276_s26  }
 0x567 PF: > { %s2727_s17 = sld [smem:[#allocation17_spill]]  ;;  %s2728_s20 = sld [smem:[#allocation18_spill]] }
 0x568   : > { %p2730_p1 = scmp.ge.s32.totalorder %s2262_s16, 2 }
 0x56d   : > { %s1391_s12 = sand.u32 1, %s2727_s17   ;;  %p2729_p12 = scmp.ne.s32.totalorder %s2728_s20, 0 }
 0x56e   : > { %s1392_s18 = scalar_lea.sflag [#allocation5], %s1391_s12 }
 0x56f   : > { %p1978_p2 = pnand %p2730_p1, %p2729_p12 }
 0x571   : > { %2245 = dma.done.wait (!%p1978_p2), %s1392_s18, 256  }
 0x572   : > { %2247 = vsyncadd (!%p1978_p2), %s1392_s18, 4294967040  ;;  %p25_p13 = scmp.ge.s32.totalorder %s2494_s24, 4   ;;  %s2731_s13 = smov %s2254_s14 }
 0x573   : > { %s2732_s14 = smov %s2258_s15  ;;  %s2733_s15 = smov %s2503_s29 }
 0x574   : > { %s2734_s16 = smov %s2494_s24  ;;  %27 = sbr.rel (!%p25_p13) target bundleno = 10 (0xa), region = 125 }
 0x57b   :  { %1397 = vsyncpa [#allocation4], 1 }
 0x57c   :  { %1399 = vsyncpa [#allocation4 + $0x1], 1 }
 0x57d   :  { %1400 = vsyncpa [#allocation7], 1 }
 0x57e   :  { %1401 = vsyncpa [#allocation10], 1 }
 0x57f   :  { %1402 = vsyncpa [#allocation5], 1 }
 0x580   :  { %1404 = vsyncpa [#allocation5 + $0x1], 1 }

</bundles_post_ra>
